<compile_context>
chip_gen: v7x
topology: tpu7x:2x2x1
jax: 0.10.0
libtpu: 0.0.40
codegen_flags: <defaults>
</compile_context>

<pallas_src>
import functools

import jax
import jax.numpy as jnp
from jax.experimental import pallas as pl
from jax.experimental.pallas import tpu as pltpu


_LANE = 128
_SUBLANE = 8
_TILE_VMEM_BUDGET = 40 * 1024 * 1024   # bytes reserved for pipelined tiles
_VMEM_LIMIT_BYTES = 48 * 1024 * 1024   # scoped VMEM limit (safe on v7x 64 MiB)


def _round_up(n, m):
    return ((n + m - 1) // m) * m


def _choose_tile_m(m, hidden, l_pad):
    """Largest token tile that fits the VMEM budget, >=2 grid steps when possible."""
    # x tile double-buffered + output tile double-buffered, per row of tokens.
    bytes_per_row = (2 * hidden + 2 * l_pad) * 4
    # Weight (single-buffered, resident) + bias.
    resident = (l_pad * hidden + l_pad) * 4
    max_rows = max(_SUBLANE, (_TILE_VMEM_BUDGET - resident) // bytes_per_row)
    tile = max(_SUBLANE, min(2048, (max_rows // _SUBLANE) * _SUBLANE))
    # Ensure the 1-D parallel grid has at least two blocks (megacore / v7x 2 TCs).
    if m > _SUBLANE and pl.cdiv(m, tile) < 2:
        tile = _round_up(pl.cdiv(m, 2), _SUBLANE)
    # No point exceeding the (sublane-rounded) token count.
    return min(tile, _round_up(m, _SUBLANE))


def _slot_classifier_kernel(x_ref, w_ref, b_ref, o_ref):
    # x_ref: (TILE_M, H)  w_ref: (H, L_pad)  b_ref: (1, L_pad)  o_ref: (TILE_M, L_pad)
    acc = jnp.dot(x_ref[...], w_ref[...], preferred_element_type=jnp.float32)
    o_ref[...] = (acc + b_ref[...]).astype(o_ref.dtype)


@jax.jit
def slot_classifier_forward(x, weight, bias):
    """Equivalent of SlotClassifier.forward (dropout_rate=0.0).

    x:      (batch, seq, hidden)
    weight: (num_slot_labels, hidden)   -- PyTorch nn.Linear convention
    bias:   (num_slot_labels,)
    returns (batch, seq, num_slot_labels)
    """
    batch, seq, hidden = x.shape
    num_slot_labels = weight.shape[0]
    m = batch * seq

    # Lane-dense logits: pad L up to a multiple of 128 (== 128 for small L).
    # Do NOT widen further: extra lanes are pure wasted store bandwidth.
    l_pad = _round_up(num_slot_labels, _LANE)

    tile_m = _choose_tile_m(m, hidden, l_pad)
    grid_m = pl.cdiv(m, tile_m)          # ragged last block handled by Pallas

    x2d = x.reshape(m, hidden)           # free for contiguous layouts

    # Pad L with zero rows / zero bias entries, transpose ONCE to (H, L_pad)
    # so the kernel's dot is a standard contraction (no per-step relayout of
    # the loop-invariant weight).
    w_p = weight
    b_p = bias
    if l_pad != num_slot_labels:
        w_p = jnp.pad(weight, ((0, l_pad - num_slot_labels), (0, 0)))
        b_p = jnp.pad(bias, (0, l_pad - num_slot_labels))
    w_t = w_p.T                          # (hidden, l_pad), one-time small cost
    b2d = b_p.reshape(1, l_pad)

    elem = x.dtype.itemsize
    cost = pl.CostEstimate(
        flops=2 * m * hidden * l_pad,
        transcendentals=0,
        bytes_accessed=elem * (m * hidden + hidden * l_pad + m * l_pad),
    )

    out2d = pl.pallas_call(
        _slot_classifier_kernel,
        out_shape=jax.ShapeDtypeStruct((m, l_pad), x.dtype),
        grid_spec=pl.GridSpec(
            grid=(grid_m,),
            in_specs=[
                # x: tiled along M, full hidden on the lane axis.
                pl.BlockSpec((tile_m, hidden), lambda i: (i, 0)),
                # weight / bias: constant index_map, single-buffered, resident.
                pl.BlockSpec((hidden, l_pad), lambda i: (0, 0),
                             pipeline_mode=pl.Buffered(1)),
                pl.BlockSpec((1, l_pad), lambda i: (0, 0),
                             pipeline_mode=pl.Buffered(1)),
            ],
            out_specs=pl.BlockSpec((tile_m, l_pad), lambda i: (i, 0)),
        ),
        compiler_params=pltpu.CompilerParams(
            dimension_semantics=("parallel",),
            vmem_limit_bytes=_VMEM_LIMIT_BYTES,
        ),
        cost_estimate=cost,
    )(x2d, w_t, b2d)

    # Lane-padding slice only (no M-padding anymore). Consumers that tolerate
    # padded logits should consume out2d directly to skip this extra pass.
    out = out2d[:, :num_slot_labels]
    return out.reshape(batch, seq, num_slot_labels)


if __name__ == "__main__":
    # Small shapes consistent with the module: token-level classifier.
    batch, seq, hidden = 2, 8, 32
    num_slot_labels = 16

    key = jax.random.PRNGKey(0)
    kx, kw, kb = jax.random.split(key, 3)

    x = jax.random.normal(kx, (batch, seq, hidden), dtype=jnp.float32)
    # Deterministic parameter init (shapes match nn.Linear(input_dim, num_slot_labels)).
    bound = 1.0 / jnp.sqrt(hidden)
    weight = jax.random.uniform(kw, (num_slot_labels, hidden),
                                minval=-bound, maxval=bound, dtype=jnp.float32)
    bias = jax.random.uniform(kb, (num_slot_labels,),
                              minval=-bound, maxval=bound, dtype=jnp.float32)

    out = slot_classifier_forward(x, weight, bias)
    jax.block_until_ready(out)

    # Reference check against plain JAX (dropout_rate=0.0 -> identity).
    ref = x @ weight.T + bias
    assert out.shape == (batch, seq, num_slot_labels)
    assert jnp.allclose(out, ref, atol=1e-5, rtol=1e-5)

    print("KERNEL_OK")
</pallas_src>

<mosaic_0001>
module attributes {stable_mosaic.version = 11 : i64} {
  func.func @_slot_classifier_kernel(%arg0: i32, %arg1: memref<8x32xf32, #tpu.memory_space<vmem>>, %arg2: memref<32x128xf32, #tpu.memory_space<vmem>>, %arg3: memref<1x128xf32, #tpu.memory_space<vmem>>, %arg4: memref<8x128xf32, #tpu.memory_space<vmem>>) attributes {dimension_semantics = [#tpu.dimension_semantics<parallel>], iteration_bounds = array<i64: 2>, scalar_prefetch = 0 : i64, scratch_operands = 0 : i64, tpu.core_type = #tpu.core_type<tc>, window_params = [{transform_indices = @transform_0, window_bounds = array<i64: 8, 32>}, {pipeline_mode = #tpu.pipeline_mode<synchronous>, transform_indices = @transform_1, window_bounds = array<i64: 32, 128>}, {pipeline_mode = #tpu.pipeline_mode<synchronous>, transform_indices = @transform_2, window_bounds = array<i64: 1, 128>}, {transform_indices = @transform_3, window_bounds = array<i64: 8, 128>}]} {
    %c0 = arith.constant 0 : index
    %c0_0 = arith.constant 0 : index
    %0 = vector.load %arg1[%c0, %c0_0] : memref<8x32xf32, #tpu.memory_space<vmem>>, vector<8x32xf32>
    %c0_1 = arith.constant 0 : index
    %c0_2 = arith.constant 0 : index
    %1 = vector.load %arg2[%c0_1, %c0_2] : memref<32x128xf32, #tpu.memory_space<vmem>>, vector<32x128xf32>
    %cst = arith.constant dense<0.000000e+00> : vector<8x128xf32>
    %2 = tpu.matmul %0, %1, %cst {dimension_numbers = #tpu.dot_dimension_numbers<[1], [0], [0], [1], [0, 0, 1, 1], [], []>} : vector<8x32xf32>, vector<32x128xf32>, vector<8x128xf32> -> vector<8x128xf32>
    %c0_3 = arith.constant 0 : index
    %c0_4 = arith.constant 0 : index
    %3 = vector.load %arg3[%c0_3, %c0_4] : memref<1x128xf32, #tpu.memory_space<vmem>>, vector<1x128xf32>
    %4 = vector.broadcast %3 : vector<1x128xf32> to vector<8x128xf32>
    %5 = arith.addf %2, %4 : vector<8x128xf32>
    %c0_5 = arith.constant 0 : index
    %c0_6 = arith.constant 0 : index
    %6 = vector.load %arg4[%c0_5, %c0_6] : memref<8x128xf32, #tpu.memory_space<vmem>>, vector<8x128xf32>
    tpu.vector_store %arg4[%c0_5, %c0_6], %5 {strides = array<i32>} : memref<8x128xf32, #tpu.memory_space<vmem>>, vector<8x128xf32>,
    return
  }
  func.func @transform_0(%arg0: i32) -> (i32, i32) {
    %c0_i32 = arith.constant 0 : i32
    %c0_i32_0 = arith.constant 0 : i32
    return %arg0, %c0_i32 : i32, i32
  }
  func.func @transform_1(%arg0: i32) -> (i32, i32) {
    %c0_i32 = arith.constant 0 : i32
    %c0_i32_0 = arith.constant 0 : i32
    %c0_i32_1 = arith.constant 0 : i32
    return %c0_i32, %c0_i32_0 : i32, i32
  }
  func.func @transform_2(%arg0: i32) -> (i32, i32) {
    %c0_i32 = arith.constant 0 : i32
    %c0_i32_0 = arith.constant 0 : i32
    %c0_i32_1 = arith.constant 0 : i32
    return %c0_i32, %c0_i32_0 : i32, i32
  }
  func.func @transform_3(%arg0: i32) -> (i32, i32) {
    %c0_i32 = arith.constant 0 : i32
    %c0_i32_0 = arith.constant 0 : i32
    return %arg0, %c0_i32 : i32, i32
  }
}

</mosaic_0001>

<bundles_post_ra>
// kernel: slot_classifier_forward.1
= control target key start
LH: loop header
LB: loop body
LE: loop exit
PB: predicated region body
PF: predicated region fallthrough
CT: control target
= control target key end

     0   :  { %s381_s12 = smov 0   ;;  %s413_s0 = inlined_call_operand.vmem [shape: f32[16,32], index: 0, kind: input, shape index: {}]   ;;  %s414_s1 = inlined_call_operand.vmem [shape: f32[32,128], index: 1, kind: input, shape index: {}]   ;;  %s415_s2 = inlined_call_operand.vmem [shape: f32[1,128], index: 2, kind: input, shape index: {}]   ;;  %s416_s3 = inlined_call_operand.vmem [shape: f32[16,128], index: 3, kind: output, shape index: {}]  }
   0x1 LB: > { %s306_s13 = sadd.s32 4294967295, %s356_s12   ;;  %p310_p0 = scmp.ge.s32.totalorder %s356_s12, 1  ;;  %s356_s12 = sphi %s381_s12, %s13_s12  }
   0x2   : > { %p136_p1 = scmp.lt.s32.totalorder %s356_s12, 3 }
   0x4   : > { %p137_p2 = pnand %p310_p0, %p136_p1 }
   0x5   : > { %v167_v0 = vld [vmem:[%s414_s1] sm:$0xff] (!%p137_p2)  ;;  %v168_v1 = vld [vmem:[%s414_s1 + $0x8] sm:$0xff] (!%p137_p2)  ;;  %v169_v2 = vld [vmem:[%s414_s1 + $0x10] sm:$0xff] (!%p137_p2)  ;;  %v358_v3 = vmov (!%p137_p2), 0.0|0.0   ;;  %vm359_vm0 = vmmov (!%p137_p2), 0   ;;  %v360_v6 = vmov (!%p137_p2), 0.0  }
   0x6   : > { %140 = sbr.rel (%p137_p2) target bundleno = 232 (0xe8), region = 32  ;;  %333 = vmatprep.subr.bf16.mxu0 (!%p137_p2), %v358_v3  ;;  %v334_v4 = vpack.c.bf16 (!%p137_p2), %v168_v1, %v167_v0  ;;  %v170_v5 = vld [vmem:[%s414_s1 + $0x18] sm:$0xff] (!%p137_p2)  ;;  %330 = vmatprep.mubr.msk.f32.mxu0 (!%p137_p2), %vm359_vm0, %v360_v6  ;;  %p158_p3 = scmp.lt.s32.totalorder (!%p137_p2), %s306_s13, 1  ;;  %vm178_vm1 = vcmask (!%p137_p2), 261120   ;;  %v313_v9 = vld [vmem:[%s415_s2] ss:$0 sm:$0xff] (!%p137_p2) }
   0x7   : > { %v337_v7 = vpack.c.bf16 (!%p137_p2), %v170_v5, %v169_v2 }
   0x8   : > { %335 = vmatpush3.bf16.msra.mxu0 (!%p137_p2), %v334_v4 }
   0x9   : > { %336 = vmatprep.subr.bf16.mxu0 (!%p137_p2), %v358_v3 }
   0xc   : > { %338 = vmatpush3.bf16.msra.mxu0 (!%p137_p2), %v337_v7 }
   0xd   : > { %s418_s13 = smov (!%p158_p3, %s306_s13), 1 }
   0xe   : > { %s311_s22 = sshll.u32 %s418_s13, 3 }
   0xf   : > { %s161_s25 = scalar_lea.vmem %s413_s0, %s311_s22  ;;  %s165_s30 = scalar_lea.vmem %s416_s3, %s311_s22 }
  0x10   : > { %v166_v8 = vld [vmem:[%s161_s25] sm:$0xff] }
  0x11   : > { %331 = vmatmul.mubr.msk.f32.vlgmr.msra.gmra.mrb[0].mxu0 %vm178_vm1, %v166_v8 }
  0xe4   : > { %v248_v10 = vpop.f32.mrb[0].mxu0 }
  0xe5   : > { %v249_v11 = vadd.f32 %v313_v9, %v248_v10  ;;  %v332_v12 = vpop.f32.mrb[1].mxu0 }
  0xe7   : > { %252 = vst [vmem:[%s165_s30] sm:$0xff] %v249_v11 }
  0xe8 PF: > { %s13_s12 = sadd.s32 1, %s356_s12  }
  0xe9   : > { %p10_p4 = scmp.ge.s32.totalorder %s13_s12, 4  }
  0xeb   :  { %12 = sbr.rel (!%p10_p4) target bundleno = 1 (0x1), region = 62 }

</bundles_post_ra>
